<compile_context>
chip_gen: v7x
topology: tpu7x:2x2x1
jax: 0.10.0
libtpu: 0.0.40
codegen_flags: <defaults>
</compile_context>

<pallas_src>
import jax
import jax.numpy as jnp
from jax.experimental import pallas as pl
from jax.experimental.pallas import tpu as pltpu

LANE = 128                      # TPU vreg lane width
SMALL_BATCH_THRESHOLD = 2048    # below this, plain XLA fusion wins


def _round_up(n, m):
    return ((n + m - 1) // m) * m


def _packed_linear_sub_clamp_kernel(xp_ref, w_ref, b_ref, o_ref):
    # xp_ref: (TB, PACK*IN)    packed activations (PACK logical rows per row)
    # w_ref:  (PACK*IN, 128)   block-diagonal weight, VMEM-resident
    # b_ref:  (1, 128)         tiled bias with the "-1" already folded in
    # o_ref:  (TB, 128)        lane-dense packed output (unmasked vst)
    acc = jnp.dot(
        xp_ref[...], w_ref[...],
        preferred_element_type=jnp.float32,
        precision=jax.lax.Precision.HIGHEST,
    )
    acc = acc + b_ref[...]
    o_ref[...] = jnp.clip(acc, -1.0, 1.0).astype(o_ref.dtype)


def make_params(w, b):
    """One-time parameter transform.

    w: (IN, OUT) f32  -- NOTE: torch nn.Linear stores (OUT, IN); transpose first.
    b: (OUT,) or (1, OUT) f32

    Returns (w_big, b_tiled, in_features, out_features) where
      w_big   = block_diag of PACK copies of w, shape (PACK*IN, PACK*OUT=128)
      b_tiled = tile(b - 1, PACK),               shape (1, 128)
    """
    IN, OUT = w.shape
    assert LANE % OUT == 0, "row-packing layout assumes OUT divides 128"
    pack = LANE // OUT
    b_eff = jnp.reshape(b, (1, OUT)).astype(jnp.float32) - 1.0
    w_big = jnp.kron(jnp.eye(pack, dtype=w.dtype), w)          # (pack*IN, 128)
    b_tiled = jnp.tile(b_eff, (1, pack))                       # (1, 128)
    return w_big, b_tiled, IN, OUT


def linear_sub_clamp(x, w_big, b_tiled, in_features, out_features):
    """y = clamp(x @ W + b - 1, -1, 1) using packed, bias-folded params."""
    B, IN = x.shape
    assert IN == in_features
    pack = w_big.shape[0] // in_features
    OUT_PACKED = w_big.shape[1]
    assert OUT_PACKED == pack * out_features == LANE

    # ---- small-batch fallback: a Pallas launch is pure overhead here ----
    if B < SMALL_BATCH_THRESHOLD:
        w = w_big[:in_features, :out_features]       # first diagonal block
        b_eff = b_tiled[:, :out_features]
        return jnp.clip(x @ w + b_eff, -1.0, 1.0)

    # ---- pack 16 logical rows per 128-lane row ----
    B_pack = _round_up(B, pack)
    if B_pack != B:
        x = jnp.pad(x, ((0, B_pack - B), (0, 0)))
    rows = B_pack // pack
    xp = x.reshape(rows, pack * IN)                  # contiguous, free

    # ---- batch-tile choice: multiple of 8, >= 8 grid steps, capped ----
    MIN_STEPS = 8
    CAP = 2048
    TB = min(CAP, max(8, _round_up(pl.cdiv(rows, MIN_STEPS), 8)))
    rows_pad = _round_up(rows, TB)                   # waste bounded by TB-1
    if rows_pad != rows:
        xp = jnp.pad(xp, ((0, rows_pad - rows), (0, 0)))

    out_packed = pl.pallas_call(
        _packed_linear_sub_clamp_kernel,
        out_shape=jax.ShapeDtypeStruct((rows_pad, OUT_PACKED), jnp.float32),
        grid=(rows_pad // TB,),
        in_specs=[
            pl.BlockSpec((TB, pack * IN), lambda i: (i, 0)),       # tiled x
            pl.BlockSpec((pack * IN, OUT_PACKED), lambda i: (0, 0)),  # resident W
            pl.BlockSpec((1, OUT_PACKED), lambda i: (0, 0)),          # resident b
        ],
        out_specs=pl.BlockSpec((TB, OUT_PACKED), lambda i: (i, 0)),
        compiler_params=pltpu.CompilerParams(
            dimension_semantics=("parallel",),
        ),
    )(xp, w_big, b_tiled)

    # (rows, 128) -> (rows*pack, 8) recovers logical row order (free reshape).
    out = out_packed[:rows].reshape(B_pack, out_features)[:B]
    return out


if __name__ == "__main__":
    key = jax.random.PRNGKey(0)
    k_x, k_w, k_b, k_xl = jax.random.split(key, 4)

    IN_FEATURES = 5
    OUT_FEATURES = 8

    # Deterministic parameters (nn.Linear-style, stored transposed as (IN, OUT)).
    w = jax.random.normal(k_w, (IN_FEATURES, OUT_FEATURES), dtype=jnp.float32) * 0.1
    b = jax.random.normal(k_b, (OUT_FEATURES,), dtype=jnp.float32) * 0.1

    # One-time parameter transform (bias fold + block-diagonal row packing).
    w_big, b_tiled, in_feat, out_feat = make_params(w, b)

    # Case 1: the spec's shape (B=1) -> small-batch fallback path.
    x_small = jax.random.normal(k_x, (1, IN_FEATURES), dtype=jnp.float32)
    out_small = linear_sub_clamp(x_small, w_big, b_tiled, in_feat, out_feat)
    jax.block_until_ready(out_small)
    ref_small = jnp.clip(x_small @ w + b[None, :] - 1.0, -1.0, 1.0)
    assert out_small.shape == ref_small.shape
    assert jnp.allclose(out_small, ref_small, atol=1e-5, rtol=1e-5)

    # Case 2: larger (non-multiple-of-16) batch -> exercises the Pallas kernel,
    # the row packing, and the batch-padding / multi-step grid.
    BATCH_LARGE = 4100
    x_large = jax.random.normal(k_xl, (BATCH_LARGE, IN_FEATURES), dtype=jnp.float32)
    out_large = linear_sub_clamp(x_large, w_big, b_tiled, in_feat, out_feat)
    jax.block_until_ready(out_large)
    ref_large = jnp.clip(x_large @ w + b[None, :] - 1.0, -1.0, 1.0)
    assert out_large.shape == ref_large.shape
    assert jnp.allclose(out_large, ref_large, atol=1e-4, rtol=1e-4), (
        jnp.max(jnp.abs(out_large - ref_large)))

    print("KERNEL_OK")
</pallas_src>

<mosaic_0001>
module attributes {stable_mosaic.version = 11 : i64} {
  func.func @_packed_linear_sub_clamp_kernel(%arg0: i32, %arg1: memref<40x80xf32, #tpu.memory_space<vmem>>, %arg2: memref<80x128xf32, #tpu.memory_space<vmem>>, %arg3: memref<1x128xf32, #tpu.memory_space<vmem>>, %arg4: memref<40x128xf32, #tpu.memory_space<vmem>>) attributes {dimension_semantics = [#tpu.dimension_semantics<parallel>], iteration_bounds = array<i64: 7>, scalar_prefetch = 0 : i64, scratch_operands = 0 : i64, tpu.core_type = #tpu.core_type<tc>, window_params = [{transform_indices = @transform_0, window_bounds = array<i64: 40, 80>}, {pipeline_mode = #tpu.pipeline_mode<synchronous>, transform_indices = @transform_1, window_bounds = array<i64: 80, 128>}, {pipeline_mode = #tpu.pipeline_mode<synchronous>, transform_indices = @transform_2, window_bounds = array<i64: 1, 128>}, {transform_indices = @transform_3, window_bounds = array<i64: 40, 128>}]} {
    %c0 = arith.constant 0 : index
    %c0_0 = arith.constant 0 : index
    %0 = vector.load %arg1[%c0, %c0_0] : memref<40x80xf32, #tpu.memory_space<vmem>>, vector<40x80xf32>
    %c0_1 = arith.constant 0 : index
    %c0_2 = arith.constant 0 : index
    %1 = vector.load %arg2[%c0_1, %c0_2] : memref<80x128xf32, #tpu.memory_space<vmem>>, vector<80x128xf32>
    %cst = arith.constant dense<0.000000e+00> : vector<40x128xf32>
    %2 = tpu.matmul %0, %1, %cst {dimension_numbers = #tpu.dot_dimension_numbers<[1], [0], [0], [1], [0, 0, 1, 1], [], []>, precision = #tpu.contract_precision<fp32>} : vector<40x80xf32>, vector<80x128xf32>, vector<40x128xf32> -> vector<40x128xf32>
    %c0_3 = arith.constant 0 : index
    %c0_4 = arith.constant 0 : index
    %3 = vector.load %arg3[%c0_3, %c0_4] : memref<1x128xf32, #tpu.memory_space<vmem>>, vector<1x128xf32>
    %4 = vector.broadcast %3 : vector<1x128xf32> to vector<40x128xf32>
    %5 = arith.addf %2, %4 : vector<40x128xf32>
    %cst_5 = arith.constant -1.000000e+00 : f32
    %cst_6 = arith.constant 1.000000e+00 : f32
    %6 = vector.broadcast %cst_5 : f32 to vector<40x128xf32>
    %7 = arith.maximumf %6, %5 : vector<40x128xf32>
    %8 = vector.broadcast %cst_6 : f32 to vector<40x128xf32>
    %9 = arith.minimumf %8, %7 : vector<40x128xf32>
    %c0_7 = arith.constant 0 : index
    %c0_8 = arith.constant 0 : index
    %10 = vector.load %arg4[%c0_7, %c0_8] : memref<40x128xf32, #tpu.memory_space<vmem>>, vector<40x128xf32>
    tpu.vector_store %arg4[%c0_7, %c0_8], %9 {strides = array<i32>} : memref<40x128xf32, #tpu.memory_space<vmem>>, vector<40x128xf32>,
    return
  }
  func.func @transform_0(%arg0: i32) -> (i32, i32) {
    %c0_i32 = arith.constant 0 : i32
    %c0_i32_0 = arith.constant 0 : i32
    return %arg0, %c0_i32 : i32, i32
  }
  func.func @transform_1(%arg0: i32) -> (i32, i32) {
    %c0_i32 = arith.constant 0 : i32
    %c0_i32_0 = arith.constant 0 : i32
    %c0_i32_1 = arith.constant 0 : i32
    return %c0_i32, %c0_i32_0 : i32, i32
  }
  func.func @transform_2(%arg0: i32) -> (i32, i32) {
    %c0_i32 = arith.constant 0 : i32
    %c0_i32_0 = arith.constant 0 : i32
    %c0_i32_1 = arith.constant 0 : i32
    return %c0_i32, %c0_i32_0 : i32, i32
  }
  func.func @transform_3(%arg0: i32) -> (i32, i32) {
    %c0_i32 = arith.constant 0 : i32
    %c0_i32_0 = arith.constant 0 : i32
    return %arg0, %c0_i32 : i32, i32
  }
}

</mosaic_0001>

<bundles_post_ra>
// kernel: tpu_custom_call.1
= control target key start
LH: loop header
LB: loop body
LE: loop exit
PB: predicated region body
PF: predicated region fallthrough
CT: control target
= control target key end

     0   :  { %8 = vsyncpa [#allocation3], 0  ;;  %s1998_s0 = inlined_call_operand.vmem [shape: f32[280,80], index: 0, kind: input, shape index: {}]   ;;  %s1999_s1 = inlined_call_operand.vmem [shape: f32[80,128], index: 1, kind: input, shape index: {}]   ;;  %s2000_s2 = inlined_call_operand.vmem [shape: f32[1,128], index: 2, kind: input, shape index: {}]   ;;  %s2001_s3 = inlined_call_operand.hbm [shape: f32[280,128], index: 3, kind: output, shape index: {}]  }
   0x1   :  { %10 = vsyncpa [#allocation3 + $0x1], 0  ;;  %s1626_s12 = smov 0   ;;  %s1628_s13 = smov 0  }
   0x2   :  { %s1630_s14 = smov 0   ;;  %s1632_s15 = smov 0  }
   0x3 LB: > { %s1647_s16 = sadd.s32 4294967295, %s1598_s15   ;;  %s1036_s17 = sadd.s32 4294967294, %s1598_s15   ;;  %s1598_s15 = sphi %s1632_s15, %s2007_s15   ;;  %s1594_s14 = sphi %s1630_s14, %s2006_s14   ;;  %s1590_s13 = sphi %s1628_s13, %s2005_s13   ;;  %s1586_s12 = sphi %s1626_s12, %s2004_s12  }
   0x4   : > { %s1651_s18 = sadd.s32 1, %s1598_s15   ;;  %s91_s19 = sadd.s32 1, %s1594_s14 }
   0x5   : > { %s88_s20 = ssub.s32 %s1598_s15, %s1651_s18  ;;  %p101_p0 = scmp.ne.s32.totalorder %s1594_s14, %s1590_s13 }
   0x6   : > { %p89_p1 = scmp.eq.s32.totalorder %s88_s20, 0  ;;  %p102_p2 = scmp.eq.s32.totalorder %s1647_s16, 6 }
   0x7   : > { %p107_p3 = scmp.ne.s32.totalorder %s1590_s13, %s1586_s12  ;;  %p108_p4 = scmp.eq.s32.totalorder %s1036_s17, 6 }
   0x8   : > { %s1662_s21 = scalar_select %p89_p1, %s1594_s14, %s91_s19  }
   0x9   : > { %p1664_p5 = por %p102_p2, %p101_p0  ;;  %p1668_p6 = por %p108_p4, %p107_p3 }
   0xa   : > { %p1039_p7 = scmp.ge.s32.totalorder %s1598_s15, 1  ;;  %p141_p8 = scmp.lt.s32.totalorder %s1598_s15, 8 }
   0xc   : > { %p142_p9 = pnand %p1039_p7, %p141_p8 }
   0xd   : > { %v177_v0 = vld [vmem:[%s1999_s1] sm:$0xff] (!%p142_p9)  ;;  %v178_v1 = vld [vmem:[%s1999_s1 + $0x8] sm:$0xff] (!%p142_p9)  ;;  %v179_v2 = vld [vmem:[%s1999_s1 + $0x10] sm:$0xff] (!%p142_p9)  ;;  %v1600_v3 = vmov (!%p142_p9), 0.0|0.0   ;;  %vm1601_vm0 = vmmov (!%p142_p9), 0   ;;  %v1602_v11 = vmov (!%p142_p9), 0.0  }
   0xe   : > { %145 = sbr.rel (%p142_p9) target bundleno = 326 (0x146), region = 32  ;;  %1351 = vmatprep.subr.bf16.mxu1 (!%p142_p9), %v1600_v3  ;;  %1396 = vmatprep.subr.bf16.mxu0 (!%p142_p9), %v1600_v3  ;;  %v211_v4 = vand.u32 (!%p142_p9), 4294901760, %v177_v0  ;;  %v214_v5 = vand.u32 (!%p142_p9), 4294901760, %v178_v1  ;;  %v180_v6 = vld [vmem:[%s1999_s1 + $0x18] sm:$0xff] (!%p142_p9)  ;;  %v217_v7 = vand.u32 (!%p142_p9), 4294901760, %v179_v2  ;;  %v181_v9 = vld [vmem:[%s1999_s1 + $0x20] sm:$0xff] (!%p142_p9) }
   0xf   : > { %v220_v8 = vand.u32 (!%p142_p9), 4294901760, %v180_v6  ;;  %v182_v10 = vld [vmem:[%s1999_s1 + $0x28] sm:$0xff] (!%p142_p9)  ;;  %1161 = vmatprep.mubr.msk.f32.mxu1 (!%p142_p9), %vm1601_vm0, %v1602_v11  ;;  %1266 = vmatprep.mubr.msk.f32.mxu0 (!%p142_p9), %vm1601_vm0, %v1602_v11  ;;  %s165_s9 = smul.u32 (!%p142_p9), 5, %s1647_s16  ;;  %v183_v14 = vld [vmem:[%s1999_s1 + $0x30] sm:$0xff] (!%p142_p9)  ;;  %v184_v15 = vld [vmem:[%s1999_s1 + $0x38] sm:$0xff] (!%p142_p9)  ;;  %v223_v18 = vand.u32 (!%p142_p9), 4294901760, %v181_v9 }
  0x10   : > { %v1698_v12 = vpack.c.bf16 (!%p142_p9), %v214_v5, %v211_v4  ;;  %v1701_v13 = vsub.f32 (!%p142_p9), %v177_v0, %v211_v4  ;;  %v1710_v16 = vsub.f32 (!%p142_p9), %v178_v1, %v214_v5  ;;  %v226_v19 = vand.u32 (!%p142_p9), 4294901760, %v182_v10  ;;  %v185_v24 = vld [vmem:[%s1999_s1 + $0x40] sm:$0xff] (!%p142_p9)  ;;  %v186_v25 = vld [vmem:[%s1999_s1 + $0x48] sm:$0xff] (!%p142_p9)  ;;  %s162_s4 = sand.u32 (!%p142_p9), 1, %s1590_s13   ;;  %s1603_s24 = smov (!%p142_p9), [#allocation2]  }
  0x11   : > { %v1713_v17 = vpack.c.bf16 (!%p142_p9), %v220_v8, %v217_v7  ;;  %p166_p10 = scmp.lt.s32.totalorder (!%p142_p9), %s165_s9, 34  ;;  %v1717_v20 = vsub.f32 (!%p142_p9), %v179_v2, %v217_v7  ;;  %v1719_v21 = vsub.f32 (!%p142_p9), %v180_v6, %v220_v8  ;;  %v229_v22 = vand.u32 (!%p142_p9), 4294901760, %v183_v14  ;;  %s1491_s7 = smul.u32 (!%p142_p9), 40, %s162_s4 }
  0x12   : > { %1353 = vmatpush3.bf16.msra.mxu1 (!%p142_p9), %v1698_v12  ;;  %1398 = vmatpush3.bf16.msra.mxu0 (!%p142_p9), %v1698_v12  ;;  %v232_v23 = vand.u32 (!%p142_p9), 4294901760, %v184_v15  ;;  %v338_v26 = vand.u32 (!%p142_p9), 4294901760, %v1701_v13  ;;  %v1730_v27 = vpack.c.bf16 (!%p142_p9), %v226_v19, %v223_v18  ;;  %v1732_v28 = vsub.f32 (!%p142_p9), %v181_v9, %v223_v18  ;;  %s1540_s25 = sshll.u32 (!%p142_p9), %s1603_s24, 4  ;;  %s1541_s25 = int_to_ptr.vmem [resolvable:$false] %s1540_s25 }
  0x13   : > { %1354 = vmatprep.subr.bf16.mxu1 (!%p142_p9), %v1600_v3  ;;  %1399 = vmatprep.subr.bf16.mxu0 (!%p142_p9), %v1600_v3  ;;  %vm194_vm1 = vcmask (!%p142_p9), 654336   ;;  %v345_v29 = vand.u32 (!%p142_p9), 4294901760, %v1710_v16  ;;  %v1737_v30 = vsub.f32 (!%p142_p9), %v182_v10, %v226_v19  ;;  %v235_v31 = vand.u32 (!%p142_p9), 4294901760, %v185_v24  ;;  %s1939_s8 = scalar_lea.vmem (!%p142_p9), [#allocation2], %s1491_s7  ;;  %s1542_s26 = scalar_lea.vmem (!%p142_p9), %s1541_s25, 1280 }
  0x14   : > { %v238_v32 = vand.u32 (!%p142_p9), 4294901760, %v186_v25  ;;  %v352_v33 = vand.u32 (!%p142_p9), 4294901760, %v1717_v20  ;;  %v1743_v34 = vpack.c.bf16 (!%p142_p9), %v232_v23, %v229_v22  ;;  %v1745_v35 = vsub.f32 (!%p142_p9), %v183_v14, %v229_v22  ;;  %s974_s10 = sshll.u32 (!%p142_p9), %s1939_s8, 4  ;;  %s1947_s10 = int_to_ptr.vmem [resolvable:$true] %s974_s10 }
  0x15   : > { %s2009_s9 = smov (!%p166_p10, %s165_s9), 34  ;;  %v1747_v36 = vsub.f32 %v184_v15, %v232_v23  ;;  %v359_v39 = vand.u32 4294901760, %v1719_v21  ;;  %v339_v42 = vsub.f32 %v1701_v13, %v338_v26  ;;  %v1756_v46 = vsub.f32 %v185_v24, %v235_v31  ;;  %s1536_s20 = scalar_lea.vmem %s1947_s10, 640 }
  0x16   : > { %1356 = vmatpush3.bf16.msra.mxu1 %v1713_v17  ;;  %1401 = vmatpush3.bf16.msra.mxu0 %v1713_v17  ;;  %s1040_s27 = sshll.u32 %s2009_s9, 3  ;;  %v346_v48 = vsub.f32 %v1710_v16, %v345_v29  ;;  %v353_v50 = vsub.f32 %v1717_v20, %v352_v33  ;;  %v366_v52 = vand.u32 4294901760, %v1732_v28  ;;  %v373_v53 = vand.u32 4294901760, %v1737_v30  ;;  %s1050_s9 = smul.u32 640, %s1647_s16 }
  0x17   : > { %1357 = vmatprep.subr.bf16.mxu1 %v1600_v3  ;;  %1402 = vmatprep.subr.bf16.mxu0 %v1600_v3  ;;  %s169_s30 = scalar_lea.vmem %s1998_s0, %s1040_s27  ;;  %v360_v57 = vsub.f32 %v1719_v21, %v359_v39  ;;  %v1778_v59 = vpack.c.bf16 %v238_v32, %v235_v31  ;;  %v340_v60 = vand.u32 4294901760, %v339_v42  ;;  %v1792_v4 = vsub.f32 %v186_v25, %v238_v32  ;;  %s1957_s16 = scalar_lea.sflag [#allocation3], %s162_s4 }
  0x18   : > { %v172_v37 = vld [vmem:[%s169_s30] sm:$0xff]  ;;  %v173_v38 = vld [vmem:[%s169_s30 + $0x8] sm:$0xff]  ;;  %v174_v40 = vld [vmem:[%s169_s30 + $0x10] sm:$0xff]  ;;  %v347_v0 = vand.u32 4294901760, %v346_v48  ;;  %v1412_v5 = vpack.c.bf16 %v345_v29, %v338_v26  ;;  %v367_v6 = vsub.f32 %v1732_v28, %v366_v52  ;;  %v354_v8 = vand.u32 4294901760, %v353_v50  ;;  %s1952_s19 = scalar_lea.hbm %s2001_s3, %s1050_s9  ;;  %p1537_p11 = scmp.ne.s32.totalorder %s1947_s10, %s1536_s20 }
  0x19   : > { %v196_v41 = vsel %vm194_vm1, %v172_v37, 0  ;;  %v199_v43 = vsel %vm194_vm1, %v173_v38, 0  ;;  %v202_v44 = vsel %vm194_vm1, %v174_v40, 0  ;;  %v175_v45 = vld [vmem:[%s169_s30 + $0x18] sm:$0xff]  ;;  %v176_v54 = vld [vmem:[%s169_s30 + $0x20] sm:$0xff]  ;;  %v361_v9 = vand.u32 4294901760, %v360_v57  ;;  %p1543_p0 = scmp.lt.s32.totalorder %s1947_s10, %s1541_s25  ;;  %p1544_p1 = scmp.lt.s32.totalorder %s1542_s26, %s1536_s20 }
  0x1a   : > { %1359 = vmatpush3.bf16.msra.mxu1 %v1730_v27  ;;  %1404 = vmatpush3.bf16.msra.mxu0 %v1730_v27  ;;  %v1758_v47 = vand.u32 4294901760, %v196_v41  ;;  %v1761_v49 = vand.u32 4294901760, %v199_v43  ;;  %v1766_v51 = vand.u32 4294901760, %v202_v44  ;;  %v205_v58 = vsel %vm194_vm1, %v175_v45, 0  ;;  %p1538_p12 = pnand %p1537_p11, %p1664_p5 }
  0x1b   : > { %1360 = vmatprep.subr.bf16.mxu1 %v1600_v3  ;;  %1405 = vmatprep.subr.bf16.mxu0 %v1600_v3  ;;  %v1783_v62 = vand.u32 4294901760, %v205_v58  ;;  %v208_v2 = vsel %vm194_vm1, %v176_v54, 0  ;;  %v374_v10 = vsub.f32 %v1737_v30, %v373_v53  ;;  %v1367_v23 = vpack.c.bf16 %v347_v0, %v340_v60  ;;  %p1545_p2 = por %p1544_p1, %p1543_p0 }
  0x1c   : > { %v1771_v55 = vsub.f32 %v196_v41, %v1758_v47  ;;  %v1774_v56 = vsub.f32 %v199_v43, %v1761_v49  ;;  %v1781_v61 = vsub.f32 %v202_v44, %v1766_v51  ;;  %v1802_v19 = vand.u32 4294901760, %v208_v2  ;;  %p1539_p13 = pneg %p1538_p12 }
  0x1d   : > { %v1800_v18 = vsub.f32 %v205_v58, %v1783_v62  ;;  %v380_v24 = vand.u32 4294901760, %v1745_v35  ;;  %v387_v25 = vand.u32 4294901760, %v1747_v36  ;;  %v1370_v26 = vpack.c.bf16 %v361_v9, %v354_v8 }
  0x1e   : > { %1362 = vmatpush3.bf16.msra.mxu1 %v1743_v34  ;;  %1407 = vmatpush3.bf16.msra.mxu0 %v1743_v34  ;;  %v287_v63 = vand.u32 4294901760, %v1771_v55  ;;  %v297_v1 = vand.u32 4294901760, %v1774_v56  ;;  %v307_v15 = vand.u32 4294901760, %v1781_v61  ;;  %v1415_v29 = vpack.c.bf16 %v359_v39, %v352_v33  ;;  %p1546_p3 = pnand %p1545_p2, %p1539_p13 }
  0x1f   : > { %1363 = vmatprep.subr.bf16.mxu1 %v1600_v3  ;;  %1408 = vmatprep.subr.bf16.mxu0 %v1600_v3  ;;  %v368_v31 = vand.u32 4294901760, %v367_v6  ;;  %v375_v32 = vand.u32 4294901760, %v374_v10  ;;  %v317_v40 = vand.u32 4294901760, %v1800_v18  ;;  %v1813_v41 = vsub.f32 %v208_v2, %v1802_v19 }
  0x20   : > { %v288_v7 = vsub.f32 %v1771_v55, %v287_v63  ;;  %v298_v14 = vsub.f32 %v1774_v56, %v297_v1  ;;  %v308_v38 = vsub.f32 %v1781_v61, %v307_v15  ;;  %v381_v42 = vsub.f32 %v1745_v35, %v380_v24 }
  0x21   : > { %v388_v43 = vsub.f32 %v1747_v36, %v387_v25  ;;  %v394_v33 = vand.u32 4294901760, %v1756_v46  ;;  %v401_v39 = vand.u32 4294901760, %v1792_v4  ;;  %v1418_v44 = vpack.c.bf16 %v373_v53, %v366_v52 }
  0x22   : > { %1365 = vmatpush3.bf16.msra.mxu1 %v1778_v59  ;;  %1410 = vmatpush3.bf16.msra.mxu0 %v1778_v59  ;;  %v289_v22 = vand.u32 4294901760, %v288_v7  ;;  %v299_v37 = vand.u32 4294901760, %v298_v14  ;;  %v309_v45 = vand.u32 4294901760, %v308_v38  ;;  %v1373_v48 = vpack.c.bf16 %v375_v32, %v368_v31 }
  0x23   : > { %1366 = vmatprep.subr.bf16.mxu1 %v1600_v3  ;;  %1411 = vmatprep.subr.bf16.mxu0 %v1600_v3  ;;  %v318_v50 = vsub.f32 %v1800_v18, %v317_v40  ;;  %v327_v54 = vand.u32 4294901760, %v1813_v41  ;;  %v382_v57 = vand.u32 4294901760, %v381_v42  ;;  %v389_v58 = vand.u32 4294901760, %v388_v43 }
  0x24   : > { %v395_v60 = vsub.f32 %v1756_v46, %v394_v33  ;;  %v1424_v8 = vpack.c.bf16 %v401_v39, %v394_v33  ;;  %v1382_v9 = vpack.c.bf16 %v1710_v16, %v1701_v13  ;;  %v1385_v13 = vpack.c.bf16 %v1719_v21, %v1717_v20 }
  0x25   : > { %1162 = vmatmul.mubr.f32.vlgmr.msra.gmra.mrb[0].mxu1 %v289_v22  ;;  %1267 = vmatmul.mubr.f32.vlgmr.msra.gmra.mrb[0].mxu0 %v287_v63  ;;  %v402_v63 = vsub.f32 %v1792_v4, %v401_v39  ;;  %v319_v52 = vand.u32 4294901760, %v318_v50  ;;  %v328_v53 = vsub.f32 %v1813_v41, %v327_v54  ;;  %v1376_v0 = vpack.c.bf16 %v389_v58, %v382_v57 }
  0x26   : > { %1368 = vmatpush3.bf16.msra.mxu1 %v1367_v23  ;;  %1413 = vmatpush3.bf16.msra.mxu0 %v1412_v5  ;;  %v396_v2 = vand.u32 4294901760, %v395_v60  ;;  %v1391_v16 = vpack.c.bf16 %v1747_v36, %v1745_v35 }
  0x27   : > { %1164 = vmatprep.mubr.msk.f32.mxu1 %vm1601_vm0, %v1602_v11  ;;  %1269 = vmatprep.mubr.msk.f32.mxu0 %vm1601_vm0, %v1602_v11  ;;  %v403_v5 = vand.u32 4294901760, %v402_v63  ;;  %v329_v6 = vand.u32 4294901760, %v328_v53 }
  0x28   : > { %1369 = vmatprep.subr.bf16.mxu1 %v1600_v3  ;;  %1414 = vmatprep.subr.bf16.mxu0 %v1600_v3 }
  0x29   : > { %1165 = vmatmul.mubr.f32.gmra.mrb[2].mxu1 %v299_v37  ;;  %1270 = vmatmul.mubr.f32.gmra.mrb[2].mxu0 %v297_v1  ;;  %v1421_v1 = vpack.c.bf16 %v387_v25, %v380_v24  ;;  %v1379_v7 = vpack.c.bf16 %v403_v5, %v396_v2 }
  0x2a   : > { %1371 = vmatpush3.bf16.msra.mxu1 %v1370_v26  ;;  %1416 = vmatpush3.bf16.msra.mxu0 %v1415_v29 }
  0x2b   : > { %1167 = vmatprep.mubr.msk.f32.mxu1 %vm1601_vm0, %v1602_v11  ;;  %1272 = vmatprep.mubr.msk.f32.mxu0 %vm1601_vm0, %v1602_v11 }
  0x2c   : > { %1372 = vmatprep.subr.bf16.mxu1 %v1600_v3  ;;  %1417 = vmatprep.subr.bf16.mxu0 %v1600_v3 }
  0x2d   : > { %1168 = vmatmul.mubr.f32.gmra.mrb[4].mxu1 %v309_v45  ;;  %1273 = vmatmul.mubr.f32.gmra.mrb[4].mxu0 %v307_v15 }
  0x2e   : > { %1374 = vmatpush3.bf16.msra.mxu1 %v1373_v48  ;;  %1419 = vmatpush3.bf16.msra.mxu0 %v1418_v44 }
  0x2f   : > { %1170 = vmatprep.mubr.msk.f32.mxu1 %vm1601_vm0, %v1602_v11  ;;  %1275 = vmatprep.mubr.msk.f32.mxu0 %vm1601_vm0, %v1602_v11 }
  0x30   : > { %1375 = vmatprep.subr.bf16.mxu1 %v1600_v3  ;;  %1420 = vmatprep.subr.bf16.mxu0 %v1600_v3 }
  0x31   : > { %1171 = vmatmul.mubr.f32.gmra.mrb[6].mxu1 %v319_v52  ;;  %1276 = vmatmul.mubr.f32.gmra.mrb[6].mxu0 %v317_v40 }
  0x32   : > { %1377 = vmatpush3.bf16.msra.mxu1 %v1376_v0  ;;  %1422 = vmatpush3.bf16.msra.mxu0 %v1421_v1 }
  0x33   : > { %1173 = vmatprep.mubr.msk.f32.mxu1 %vm1601_vm0, %v1602_v11  ;;  %1278 = vmatprep.mubr.msk.f32.mxu0 %vm1601_vm0, %v1602_v11 }
  0x34   : > { %1378 = vmatprep.subr.bf16.mxu1 %v1600_v3  ;;  %1423 = vmatprep.subr.bf16.mxu0 %v1600_v3 }
  0x35   : > { %1174 = vmatmul.mubr.f32.gmra.mrb[8].mxu1 %v329_v6  ;;  %1279 = vmatmul.mubr.f32.gmra.mrb[8].mxu0 %v327_v54 }
  0x36   : > { %1380 = vmatpush3.bf16.msra.mxu1 %v1379_v7  ;;  %1425 = vmatpush3.bf16.msra.mxu0 %v1424_v8 }
  0x37   : > { %1196 = vmatprep.mubr.msk.f32.mxu1 %vm1601_vm0, %v1602_v11  ;;  %1301 = vmatprep.mubr.msk.f32.mxu0 %vm1601_vm0, %v1602_v11 }
  0x38   : > { %1381 = vmatprep.subr.bf16.mxu1 %v1600_v3  ;;  %1426 = vmatprep.subr.bf16.mxu0 %v1600_v3 }
  0x39   : > { %1197 = vmatmul.mubr.f32.vlgmr.msra.gmra.mrb[0].mxu1 %v1758_v47  ;;  %1302 = vmatmul.mubr.f32.vlgmr.msra.gmra.mrb[0].mxu0 %v1758_v47 }
  0x3a   : > { %1383 = vmatpush3.bf16.msra.mxu1 %v1382_v9  ;;  %1428 = vmatpush3.bf16.msra.mxu0 %v1698_v12  ;;  %v1388_v12 = vpack.c.bf16 %v1737_v30, %v1732_v28 }
  0x3b   : > { %1199 = vmatprep.mubr.msk.f32.mxu1 %vm1601_vm0, %v1602_v11  ;;  %1304 = vmatprep.mubr.msk.f32.mxu0 %vm1601_vm0, %v1602_v11 }
  0x3c   : > { %1384 = vmatprep.subr.bf16.mxu1 %v1600_v3  ;;  %1429 = vmatprep.subr.bf16.mxu0 %v1600_v3 }
  0x3d   : > { %1200 = vmatmul.mubr.f32.gmra.mrb[2].mxu1 %v1761_v49  ;;  %1305 = vmatmul.mubr.f32.gmra.mrb[2].mxu0 %v1761_v49 }
  0x3e   : > { %1386 = vmatpush3.bf16.msra.mxu1 %v1385_v13  ;;  %1431 = vmatpush3.bf16.msra.mxu0 %v1713_v17  ;;  %v1394_v17 = vpack.c.bf16 %v1792_v4, %v1756_v46 }
  0x3f   : > { %1202 = vmatprep.mubr.msk.f32.mxu1 %vm1601_vm0, %v1602_v11  ;;  %1307 = vmatprep.mubr.msk.f32.mxu0 %vm1601_vm0, %v1602_v11 }
  0x40   : > { %1387 = vmatprep.subr.bf16.mxu1 %v1600_v3  ;;  %1432 = vmatprep.subr.bf16.mxu0 %v1600_v3 }
  0x41   : > { %1203 = vmatmul.mubr.f32.gmra.mrb[4].mxu1 %v1766_v51  ;;  %1308 = vmatmul.mubr.f32.gmra.mrb[4].mxu0 %v1766_v51 }
  0x42   : > { %1389 = vmatpush3.bf16.msra.mxu1 %v1388_v12  ;;  %1434 = vmatpush3.bf16.msra.mxu0 %v1730_v27 }
  0x43   : > { %1205 = vmatprep.mubr.msk.f32.mxu1 %vm1601_vm0, %v1602_v11  ;;  %1310 = vmatprep.mubr.msk.f32.mxu0 %vm1601_vm0, %v1602_v11 }
  0x44   : > { %1390 = vmatprep.subr.bf16.mxu1 %v1600_v3  ;;  %1435 = vmatprep.subr.bf16.mxu0 %v1600_v3 }
  0x45   : > { %1206 = vmatmul.mubr.f32.gmra.mrb[6].mxu1 %v1783_v62  ;;  %1311 = vmatmul.mubr.f32.gmra.mrb[6].mxu0 %v1783_v62 }
  0x46   : > { %1392 = vmatpush3.bf16.msra.mxu1 %v1391_v16  ;;  %1437 = vmatpush3.bf16.msra.mxu0 %v1743_v34 }
  0x47   : > { %1208 = vmatprep.mubr.msk.f32.mxu1 %vm1601_vm0, %v1602_v11  ;;  %1313 = vmatprep.mubr.msk.f32.mxu0 %vm1601_vm0, %v1602_v11 }
  0x48   : > { %1393 = vmatprep.subr.bf16.mxu1 %v1600_v3  ;;  %1438 = vmatprep.subr.bf16.mxu0 %v1600_v3  ;;  %v1041_v3 = vld [vmem:[%s2000_s2] ss:$0 sm:$0xff] }
  0x49   : > { %1209 = vmatmul.mubr.f32.gmra.mrb[8].mxu1 %v1802_v19  ;;  %1314 = vmatmul.mubr.f32.gmra.mrb[8].mxu0 %v1802_v19 }
  0x4a   : > { %1395 = vmatpush3.bf16.msra.mxu1 %v1394_v17  ;;  %1440 = vmatpush3.bf16.msra.mxu0 %v1778_v59 }
  0x4b   : > { %1231 = vmatprep.mubr.msk.f32.mxu1 %vm1601_vm0, %v1602_v11  ;;  %1336 = vmatprep.mubr.msk.f32.mxu0 %vm1601_vm0, %v1602_v11 }
  0x4d   : > { %1232 = vmatmul.mubr.f32.vlgmr.msra.gmra.mrb[0].mxu1 %v1771_v55  ;;  %1337 = vmatmul.mubr.f32.vlgmr.msra.gmra.mrb[0].mxu0 %v1758_v47 }
  0x4e   : > { %1234 = vmatprep.mubr.msk.f32.mxu1 %vm1601_vm0, %v1602_v11  ;;  %1339 = vmatprep.mubr.msk.f32.mxu0 %vm1601_vm0, %v1602_v11 }
  0x51   : > { %1235 = vmatmul.mubr.f32.gmra.mrb[2].mxu1 %v1774_v56  ;;  %1340 = vmatmul.mubr.f32.gmra.mrb[2].mxu0 %v1761_v49 }
  0x52   : > { %1237 = vmatprep.mubr.msk.f32.mxu1 %vm1601_vm0, %v1602_v11  ;;  %1342 = vmatprep.mubr.msk.f32.mxu0 %vm1601_vm0, %v1602_v11 }
  0x55   : > { %1238 = vmatmul.mubr.f32.gmra.mrb[4].mxu1 %v1781_v61  ;;  %1343 = vmatmul.mubr.f32.gmra.mrb[4].mxu0 %v1766_v51 }
  0x56   : > { %1240 = vmatprep.mubr.msk.f32.mxu1 %vm1601_vm0, %v1602_v11  ;;  %1345 = vmatprep.mubr.msk.f32.mxu0 %vm1601_vm0, %v1602_v11 }
  0x59   : > { %1241 = vmatmul.mubr.f32.gmra.mrb[6].mxu1 %v1800_v18  ;;  %1346 = vmatmul.mubr.f32.gmra.mrb[6].mxu0 %v1783_v62 }
  0x5a   : > { %1243 = vmatprep.mubr.msk.f32.mxu1 %vm1601_vm0, %v1602_v11  ;;  %1348 = vmatprep.mubr.msk.f32.mxu0 %vm1601_vm0, %v1602_v11 }
  0x5d   : > { %1244 = vmatmul.mubr.f32.gmra.mrb[8].mxu1 %v1813_v41  ;;  %1349 = vmatmul.mubr.f32.gmra.mrb[8].mxu0 %v1802_v19 }
 0x120   : > { %v568_v20 = vpop.f32.mrb[0].mxu1  ;;  %v917_v21 = vpop.f32.mrb[0].mxu0 }
 0x121   : > { %v1441_v27 = vadd.f32 %v1041_v3, %v568_v20  ;;  %v1233_v28 = vpop.f32.mrb[1].mxu1  ;;  %v1338_v30 = vpop.f32.mrb[1].mxu0 }
 0x123   : > { %v1442_v34 = vadd.f32 %v1441_v27, %v917_v21 }
 0x124   : > { %v575_v35 = vpop.f32.mrb[2].mxu1  ;;  %v923_v36 = vpop.f32.mrb[2].mxu0 }
 0x125   : > { %v1042_v11 = vclamps-f32 %v1442_v34, 1.0  ;;  %v1443_v46 = vadd.f32 %v1041_v3, %v575_v35  ;;  %v1236_v47 = vpop.f32.mrb[3].mxu1  ;;  %v1341_v49 = vpop.f32.mrb[3].mxu0 }
 0x127   : > { %955 = vst [vmem:[%s1939_s8] sm:$0xff] %v1042_v11  ;;  %v1444_v51 = vadd.f32 %v1443_v46, %v923_v36 }
 0x128   : > { %v582_v55 = vpop.f32.mrb[4].mxu1  ;;  %v929_v56 = vpop.f32.mrb[4].mxu0 }
 0x129   : > { %v1043_v59 = vclamps-f32 %v1444_v51, 1.0  ;;  %v1445_v61 = vadd.f32 %v1041_v3, %v582_v55  ;;  %v1239_v62 = vpop.f32.mrb[5].mxu1  ;;  %v1344_v4 = vpop.f32.mrb[5].mxu0 }
 0x12b   : > { %956 = vst [vmem:[%s1939_s8 + $0x8] sm:$0xff] %v1043_v59  ;;  %v1446_v10 = vadd.f32 %v1445_v61, %v929_v56 }
 0x12c   : > { %v589_v14 = vpop.f32.mrb[6].mxu1  ;;  %v935_v15 = vpop.f32.mrb[6].mxu0 }
 0x12d   : > { %v1044_v18 = vclamps-f32 %v1446_v10, 1.0  ;;  %v1447_v19 = vadd.f32 %v1041_v3, %v589_v14  ;;  %v1242_v22 = vpop.f32.mrb[7].mxu1  ;;  %v1347_v23 = vpop.f32.mrb[7].mxu0 }
 0x12f   : > { %957 = vst [vmem:[%s1939_s8 + $0x10] sm:$0xff] %v1044_v18  ;;  %v1448_v24 = vadd.f32 %v1447_v19, %v935_v15 }
 0x130   : > { %v596_v25 = vpop.f32.mrb[8].mxu1  ;;  %v941_v26 = vpop.f32.mrb[8].mxu0 }
 0x131   : > { %v1045_v29 = vclamps-f32 %v1448_v24, 1.0  ;;  %v1449_v31 = vadd.f32 %v1041_v3, %v596_v25  ;;  %v1245_v32 = vpop.f32.mrb[9].mxu1  ;;  %v1350_v37 = vpop.f32.mrb[9].mxu0 }
 0x133   : > { %958 = vst [vmem:[%s1939_s8 + $0x18] sm:$0xff] %v1045_v29  ;;  %v1450_v38 = vadd.f32 %v1449_v31, %v941_v26 }
 0x135   : > { %v1046_v40 = vclamps-f32 %v1450_v38, 1.0 }
 0x137   : > { %959 = vst [vmem:[%s1939_s8 + $0x20] sm:$0xff] %v1046_v40 }
 0x138   : > { %1549 = shalt.err (!%p1546_p3)
}
 0x139   : > { %s1550_s27 = scalar_lea.hbm %s1952_s19, 640  ;;  %s1554_s30 = scalar_lea.hbm %s2001_s3, 4480 }
 0x13a   : > { %p1551_p4 = scmp.ne.s32.totalorder %s1952_s19, %s1550_s27  ;;  %p1555_p9 = scmp.lt.u32.totalorder %s1952_s19, %s2001_s3 }
 0x13b   : > { %p1556_p10 = scmp.lt.u32.totalorder %s1554_s30, %s1550_s27  ;;  %p1558_p12 = scmp.lt.u32.totalorder %s1550_s27, %s1952_s19 }
 0x13c   : > { %p1552_p7 = pnand %p1551_p4, %p1664_p5 }
 0x13d   : > { %p1557_p11 = por %p1556_p10, %p1555_p9 }
 0x13e   : > { %p1553_p8 = pneg %p1552_p7 }
 0x13f   : > { %p1559_p13 = por %p1558_p12, %p1557_p11 }
 0x141   : > { %p1560_p0 = pnand %p1559_p13, %p1553_p8 }
 0x143   : > { %1563 = shalt.err (!%p1560_p0)
}
 0x144   : > { %s1604_s6 = smov 128   ;;  %s1605_s7 = smov 8  }
 0x145   : > { %1492 = dma.vmem_to_hbm [thread:$0]  (%p1664_p5), %s1947_s10, 640, %s1952_s19, %s1957_s16, %s1604_s6, %s1604_s6, %s1605_s7  }
 0x146 PF: > { %p1498_p1 = scmp.ge.s32.totalorder %s1598_s15, 2  ;;  %s989_s8 = sand.u32 1, %s1586_s12  }
 0x147   : > { %s990_s9 = scalar_lea.sflag [#allocation3], %s989_s8 }
 0x148   : > { %p1495_p2 = pnand %p1498_p1, %p1668_p6 }
 0x14a   : > { %1581 = dma.done.wait (!%p1495_p2), %s990_s9, 640  }
 0x14b   : > { %1583 = vsyncadd (!%p1495_p2), %s990_s9, 4294966656  ;;  %p13_p3 = scmp.ge.s32.totalorder %s1651_s18, 9   ;;  %s2004_s12 = smov %s1590_s13 }
 0x14c   : > { %s2005_s13 = smov %s1594_s14  ;;  %s2006_s14 = smov %s1662_s21 }
 0x14d   : > { %s2007_s15 = smov %s1651_s18  ;;  %15 = sbr.rel (!%p13_p3) target bundleno = 3 (0x3), region = 67 }
 0x154   :  { %995 = vsyncpa [#allocation3], 1 }
 0x155   :  { %997 = vsyncpa [#allocation3 + $0x1], 1 }

</bundles_post_ra>
